<compile_context>
chip_gen: v6e
topology: v6e:2x2x1
jax: 0.10.0
libtpu: 0.0.40
codegen_flags: <defaults>
</compile_context>

<pallas_src>
import functools

import numpy as np
import jax
import jax.numpy as jnp
from jax.experimental import pallas as pl
from jax.experimental.pallas import tpu as pltpu

_LANES = 128


def _round_up(x, m):
    return ((x + m - 1) // m) * m


def _sublane_multiple(itemsize):
    # 8 sublanes for 32-bit, 16 for 16-bit, 32 for 8-bit packed dtypes.
    return 8 * max(4 // max(int(itemsize), 1), 1)


def _embedder_kernel(x_ref, o_ref, *, freqs, log_space, exact_every):
    """x_ref: (tm, 128) lane-dense input slab.
    o_ref: (2*n_freqs, tm, 128) -- one sin slab and one cos slab per band.

    Only band 0 (and every `exact_every`-th band, to bound accumulated error)
    uses the EUP sin/cos; other bands are derived via the double-angle
    (log_space) or fixed-delta angle-addition (linspace) recurrence.
    """
    x = x_ref[...].astype(jnp.float32)  # f32 math (v5e has no bf16 VPU/EUP)
    nf = len(freqs)
    delta = (freqs[1] - freqs[0]) if (not log_space and nf > 1) else None
    sd = cd = None     # sin/cos of the linspace step, computed lazily once
    s = c = None
    for i, f in enumerate(freqs):
        if i == 0 or (i % exact_every) == 0:
            xf = x * f
            s, c = jnp.sin(xf), jnp.cos(xf)
        elif log_space:
            # f_i = 2 * f_{i-1}: sin(2a) = 2 sin a cos a, cos(2a) = 1 - 2 sin^2 a
            s, c = 2.0 * s * c, 1.0 - 2.0 * s * s
        else:
            # f_i = f_{i-1} + delta: angle addition with a fixed step
            if sd is None:
                xd = x * delta
                sd, cd = jnp.sin(xd), jnp.cos(xd)
            s, c = s * cd + c * sd, c * cd - s * sd
        o_ref[2 * i] = s.astype(o_ref.dtype)
        o_ref[2 * i + 1] = c.astype(o_ref.dtype)


def make_embedder(n_freqs: int, input_dim: int, log_space: bool = False,
                  include_identity: bool = True, row_tile: int = 1024,
                  out_dtype=None, exact_every: int = 4, layout: str = "cat"):
    """Build the embedding callable (analog of Embedder.create_embedding_function).

    layout="cat"   -> (N, input_dim * n_parts), exact torch.cat([...], -1) order.
    layout="parts" -> (identity_or_None, trig) with trig of shape
                      (2*n_freqs, N, input_dim); zero-copy, for downstream fusion.
    """
    assert layout in ("cat", "parts")
    if log_space:
        freq_bands = 2.0 ** np.linspace(0.0, n_freqs - 1, n_freqs)
    else:
        freq_bands = np.linspace(2.0 ** 0.0, 2.0 ** max(n_freqs - 1, 0), n_freqs)
    freqs = tuple(float(f) for f in freq_bands)  # static kernel constants
    n_parts = (1 if include_identity else 0) + 2 * n_freqs
    assert n_parts > 0, "Embedder must have at least one embedding function"
    out_dim = input_dim * n_parts
    n_kparts = 2 * n_freqs            # identity is NOT produced by the kernel
    exact_every = max(int(exact_every), 1)

    kernel = functools.partial(_embedder_kernel, freqs=freqs,
                               log_space=log_space, exact_every=exact_every)

    # Generation-aware VMEM budgeting: ~40% of physical VMEM for the
    # double-buffered (input + output) blocks; scoped limit raised to 50%.
    try:
        vmem_phys = int(pltpu.get_tpu_info().vmem_capacity_bytes)
    except Exception:
        vmem_phys = 64 * 1024 * 1024  # conservative fallback (v7x per-TC VMEM)
    vmem_budget = (vmem_phys * 2) // 5
    vmem_limit = vmem_phys // 2

    def embed(x):
        assert x.ndim == 2 and x.shape[1] == input_dim, x.shape
        n = x.shape[0]
        dtype = jnp.dtype(out_dtype) if out_dtype is not None else x.dtype

        if n_freqs == 0:              # identity-only embedder, no kernel needed
            ident = x.astype(dtype)
            return ident if layout == "cat" else (ident, None)

        # ---- lane-dense repacking (elementwise op => layout agnostic) ----
        total = n * input_dim
        rows = pl.cdiv(total, _LANES)

        # Sublane multiple must satisfy BOTH input and output dtype packing.
        sub = max(_sublane_multiple(jnp.dtype(x.dtype).itemsize),
                  _sublane_multiple(dtype.itemsize))

        # Double-buffered per-(128-lane)-row VMEM footprint of one grid step.
        per_row = 2 * _LANES * (jnp.dtype(x.dtype).itemsize
                                + n_kparts * dtype.itemsize)
        tm_cap = max(sub, (vmem_budget // per_row) // sub * sub)
        tm = max(row_tile // sub * sub, sub)
        tm = min(tm, tm_cap, _round_up(rows, sub))
        # Guarantee >= 2 grid steps whenever possible so the "parallel" axis
        # can be sharded across v7x's two TensorCores (harmless on v5e/v6e).
        tm = min(tm, max(sub, _round_up(pl.cdiv(rows, 2), sub)))

        grid = (pl.cdiv(rows, tm),)   # partial last block handled by Pallas

        # Free reshape when already lane-aligned; otherwise one small pad
        # (1/n_parts of total traffic) that stays fused inside this jit.
        if total == rows * _LANES:
            x_flat = x.reshape(rows, _LANES)
        else:
            x_flat = jnp.pad(x.reshape(-1),
                             (0, rows * _LANES - total)).reshape(rows, _LANES)

        out = pl.pallas_call(
            kernel,
            out_shape=jax.ShapeDtypeStruct((n_kparts, rows, _LANES), dtype),
            grid_spec=pl.GridSpec(
                grid=grid,
                in_specs=[pl.BlockSpec((tm, _LANES), lambda i: (i, 0))],
                out_specs=pl.BlockSpec((n_kparts, tm, _LANES),
                                       lambda i: (0, i, 0)),
            ),
            compiler_params=pltpu.CompilerParams(
                dimension_semantics=("parallel",),
                vmem_limit_bytes=vmem_limit),
        )(x_flat)

        trig = out.reshape(n_kparts, rows * _LANES)
        if rows * _LANES != total:
            trig = trig[:, :total]
        trig = trig.reshape(n_kparts, n, input_dim)    # (2F, N, D)

        if layout == "parts":
            ident = x.astype(dtype) if include_identity else None
            return ident, trig

        # torch.cat([x, sin(f0 x), cos(f0 x), ...], -1) order.  The transpose
        # + concat stay inside this jit; the identity part reuses x directly.
        pieces = jnp.transpose(trig, (1, 0, 2))        # (N, 2F, D)
        if include_identity:
            pieces = jnp.concatenate(
                [x.astype(dtype)[:, None, :], pieces], axis=1)
        return pieces.reshape(n, out_dim)

    return jax.jit(embed), out_dim


def embed_reference(x, n_freqs, log_space=False, include_identity=True):
    """Pure-JAX reference of the same forward for correctness checking."""
    if log_space:
        freq_bands = 2.0 ** np.linspace(0.0, n_freqs - 1, n_freqs)
    else:
        freq_bands = np.linspace(2.0 ** 0.0, 2.0 ** max(n_freqs - 1, 0), n_freqs)
    parts = [x] if include_identity else []
    for f in freq_bands:
        parts.append(jnp.sin(x * float(f)))
        parts.append(jnp.cos(x * float(f)))
    return jnp.concatenate(parts, axis=-1)


if __name__ == "__main__":
    key0, key1, key2 = jax.random.split(jax.random.PRNGKey(0), 3)

    # Case 1: tiny NeRF-style input -- 64 points of 3-D coords, 4 linspace
    # frequencies -> out_dim = 3 * (1 + 2*4) = 27.  Exercises the padded,
    # partial-single-block path.
    n_points, input_dim, n_freqs = 64, 3, 4
    x = jax.random.normal(key0, (n_points, input_dim), dtype=jnp.float32)
    embed, out_dim = make_embedder(n_freqs=n_freqs, input_dim=input_dim,
                                   log_space=False, include_identity=True)
    y = embed(x)
    jax.block_until_ready(y)
    assert y.shape == (n_points, out_dim), y.shape
    y_ref = embed_reference(x, n_freqs, log_space=False, include_identity=True)
    assert jnp.allclose(y, y_ref, atol=2e-5, rtol=1e-5), "mismatch vs reference (case 1)"

    # Case 1b: zero-copy "parts" layout (for downstream weight folding).
    embed_p, _ = make_embedder(n_freqs=n_freqs, input_dim=input_dim,
                               log_space=False, include_identity=True,
                               layout="parts")
    ident, trig = embed_p(x)
    jax.block_until_ready(trig)
    assert ident.shape == (n_points, input_dim)
    assert trig.shape == (2 * n_freqs, n_points, input_dim)
    assert jnp.allclose(trig[0], jnp.sin(x), atol=1e-5), "mismatch (parts layout)"

    # Case 2: log-space frequencies, non-trivial N, small row_tile to exercise
    # a multi-step grid and the exact/recurrence re-seeding.
    n_points2, n_freqs2 = 2048, 6
    x2 = jax.random.normal(key1, (n_points2, input_dim), dtype=jnp.float32)
    embed2, out_dim2 = make_embedder(n_freqs=n_freqs2, input_dim=input_dim,
                                     log_space=True, include_identity=True,
                                     row_tile=8)
    y2 = embed2(x2)
    jax.block_until_ready(y2)
    assert y2.shape == (n_points2, out_dim2), y2.shape
    y2_ref = embed_reference(x2, n_freqs2, log_space=True, include_identity=True)
    assert jnp.allclose(y2, y2_ref, atol=1e-4, rtol=1e-4), "mismatch vs reference (case 2)"

    # Case 3: bf16 output (halves output HBM traffic) -- exercises the
    # dual-dtype sublane-multiple logic.
    n_points3, n_freqs3 = 512, 5
    x3 = jax.random.normal(key2, (n_points3, input_dim), dtype=jnp.float32)
    embed3, out_dim3 = make_embedder(n_freqs=n_freqs3, input_dim=input_dim,
                                     log_space=True, include_identity=True,
                                     out_dtype=jnp.bfloat16)
    y3 = embed3(x3)
    jax.block_until_ready(y3)
    assert y3.shape == (n_points3, out_dim3) and y3.dtype == jnp.bfloat16
    y3_ref = embed_reference(x3, n_freqs3, log_space=True, include_identity=True)
    assert jnp.allclose(y3.astype(jnp.float32), y3_ref, atol=2e-2), \
        "mismatch vs reference (case 3, bf16)"

    print("KERNEL_OK")
</pallas_src>

<mosaic_0001>
module attributes {stable_mosaic.version = 11 : i64} {
  func.func @_embedder_kernel(%arg0: i32, %arg1: memref<8x128xf32, #tpu.memory_space<vmem>>, %arg2: memref<8x8x128xf32, #tpu.memory_space<vmem>>) attributes {dimension_semantics = [#tpu.dimension_semantics<parallel>], iteration_bounds = array<i64: 1>, scalar_prefetch = 0 : i64, scratch_operands = 0 : i64, tpu.core_type = #tpu.core_type<tc>, window_params = [{transform_indices = @transform_0, window_bounds = array<i64: 8, 128>}, {transform_indices = @transform_1, window_bounds = array<i64: 8, 8, 128>}]} {
    %c0 = arith.constant 0 : index
    %c0_0 = arith.constant 0 : index
    %0 = vector.load %arg1[%c0, %c0_0] : memref<8x128xf32, #tpu.memory_space<vmem>>, vector<8x128xf32>
    %cst = arith.constant 1.000000e+00 : f32
    %1 = vector.broadcast %cst : f32 to vector<8x128xf32>
    %2 = arith.mulf %0, %1 : vector<8x128xf32>
    %3 = math.sin %2 : vector<8x128xf32>
    %4 = math.cos %2 : vector<8x128xf32>
    %c0_1 = arith.constant 0 : index
    %c0_2 = arith.constant 0 : index
    %c0_3 = arith.constant 0 : index
    %5 = vector.load %arg2[%c0_1, %c0_2, %c0_3] : memref<8x8x128xf32, #tpu.memory_space<vmem>>, vector<1x8x128xf32>
    %6 = vector.shape_cast %5 : vector<1x8x128xf32> to vector<8x128xf32>
    %7 = vector.shape_cast %3 : vector<8x128xf32> to vector<1x8x128xf32>
    tpu.vector_store %arg2[%c0_1, %c0_2, %c0_3], %7 {strides = array<i32>} : memref<8x8x128xf32, #tpu.memory_space<vmem>>, vector<1x8x128xf32>,
    %c1 = arith.constant 1 : index
    %c0_4 = arith.constant 0 : index
    %c0_5 = arith.constant 0 : index
    %8 = vector.load %arg2[%c1, %c0_4, %c0_5] : memref<8x8x128xf32, #tpu.memory_space<vmem>>, vector<1x8x128xf32>
    %9 = vector.shape_cast %8 : vector<1x8x128xf32> to vector<8x128xf32>
    %10 = vector.shape_cast %4 : vector<8x128xf32> to vector<1x8x128xf32>
    tpu.vector_store %arg2[%c1, %c0_4, %c0_5], %10 {strides = array<i32>} : memref<8x8x128xf32, #tpu.memory_space<vmem>>, vector<1x8x128xf32>,
    %cst_6 = arith.constant 2.33333325 : f32
    %11 = vector.broadcast %cst_6 : f32 to vector<8x128xf32>
    %12 = arith.mulf %0, %11 : vector<8x128xf32>
    %13 = math.sin %12 : vector<8x128xf32>
    %14 = math.cos %12 : vector<8x128xf32>
    %15 = arith.mulf %3, %14 : vector<8x128xf32>
    %16 = arith.mulf %4, %13 : vector<8x128xf32>
    %17 = arith.addf %15, %16 : vector<8x128xf32>
    %18 = arith.mulf %4, %14 : vector<8x128xf32>
    %19 = arith.mulf %3, %13 : vector<8x128xf32>
    %20 = arith.subf %18, %19 : vector<8x128xf32>
    %c2 = arith.constant 2 : index
    %c0_7 = arith.constant 0 : index
    %c0_8 = arith.constant 0 : index
    %21 = vector.load %arg2[%c2, %c0_7, %c0_8] : memref<8x8x128xf32, #tpu.memory_space<vmem>>, vector<1x8x128xf32>
    %22 = vector.shape_cast %21 : vector<1x8x128xf32> to vector<8x128xf32>
    %23 = vector.shape_cast %17 : vector<8x128xf32> to vector<1x8x128xf32>
    tpu.vector_store %arg2[%c2, %c0_7, %c0_8], %23 {strides = array<i32>} : memref<8x8x128xf32, #tpu.memory_space<vmem>>, vector<1x8x128xf32>,
    %c3 = arith.constant 3 : index
    %c0_9 = arith.constant 0 : index
    %c0_10 = arith.constant 0 : index
    %24 = vector.load %arg2[%c3, %c0_9, %c0_10] : memref<8x8x128xf32, #tpu.memory_space<vmem>>, vector<1x8x128xf32>
    %25 = vector.shape_cast %24 : vector<1x8x128xf32> to vector<8x128xf32>
    %26 = vector.shape_cast %20 : vector<8x128xf32> to vector<1x8x128xf32>
    tpu.vector_store %arg2[%c3, %c0_9, %c0_10], %26 {strides = array<i32>} : memref<8x8x128xf32, #tpu.memory_space<vmem>>, vector<1x8x128xf32>,
    %27 = arith.mulf %17, %14 : vector<8x128xf32>
    %28 = arith.mulf %20, %13 : vector<8x128xf32>
    %29 = arith.addf %27, %28 : vector<8x128xf32>
    %30 = arith.mulf %20, %14 : vector<8x128xf32>
    %31 = arith.mulf %17, %13 : vector<8x128xf32>
    %32 = arith.subf %30, %31 : vector<8x128xf32>
    %c4 = arith.constant 4 : index
    %c0_11 = arith.constant 0 : index
    %c0_12 = arith.constant 0 : index
    %33 = vector.load %arg2[%c4, %c0_11, %c0_12] : memref<8x8x128xf32, #tpu.memory_space<vmem>>, vector<1x8x128xf32>
    %34 = vector.shape_cast %33 : vector<1x8x128xf32> to vector<8x128xf32>
    %35 = vector.shape_cast %29 : vector<8x128xf32> to vector<1x8x128xf32>
    tpu.vector_store %arg2[%c4, %c0_11, %c0_12], %35 {strides = array<i32>} : memref<8x8x128xf32, #tpu.memory_space<vmem>>, vector<1x8x128xf32>,
    %c5 = arith.constant 5 : index
    %c0_13 = arith.constant 0 : index
    %c0_14 = arith.constant 0 : index
    %36 = vector.load %arg2[%c5, %c0_13, %c0_14] : memref<8x8x128xf32, #tpu.memory_space<vmem>>, vector<1x8x128xf32>
    %37 = vector.shape_cast %36 : vector<1x8x128xf32> to vector<8x128xf32>
    %38 = vector.shape_cast %32 : vector<8x128xf32> to vector<1x8x128xf32>
    tpu.vector_store %arg2[%c5, %c0_13, %c0_14], %38 {strides = array<i32>} : memref<8x8x128xf32, #tpu.memory_space<vmem>>, vector<1x8x128xf32>,
    %39 = arith.mulf %29, %14 : vector<8x128xf32>
    %40 = arith.mulf %32, %13 : vector<8x128xf32>
    %41 = arith.addf %39, %40 : vector<8x128xf32>
    %42 = arith.mulf %32, %14 : vector<8x128xf32>
    %43 = arith.mulf %29, %13 : vector<8x128xf32>
    %44 = arith.subf %42, %43 : vector<8x128xf32>
    %c6 = arith.constant 6 : index
    %c0_15 = arith.constant 0 : index
    %c0_16 = arith.constant 0 : index
    %45 = vector.load %arg2[%c6, %c0_15, %c0_16] : memref<8x8x128xf32, #tpu.memory_space<vmem>>, vector<1x8x128xf32>
    %46 = vector.shape_cast %45 : vector<1x8x128xf32> to vector<8x128xf32>
    %47 = vector.shape_cast %41 : vector<8x128xf32> to vector<1x8x128xf32>
    tpu.vector_store %arg2[%c6, %c0_15, %c0_16], %47 {strides = array<i32>} : memref<8x8x128xf32, #tpu.memory_space<vmem>>, vector<1x8x128xf32>,
    %c7 = arith.constant 7 : index
    %c0_17 = arith.constant 0 : index
    %c0_18 = arith.constant 0 : index
    %48 = vector.load %arg2[%c7, %c0_17, %c0_18] : memref<8x8x128xf32, #tpu.memory_space<vmem>>, vector<1x8x128xf32>
    %49 = vector.shape_cast %48 : vector<1x8x128xf32> to vector<8x128xf32>
    %50 = vector.shape_cast %44 : vector<8x128xf32> to vector<1x8x128xf32>
    tpu.vector_store %arg2[%c7, %c0_17, %c0_18], %50 {strides = array<i32>} : memref<8x8x128xf32, #tpu.memory_space<vmem>>, vector<1x8x128xf32>,
    return
  }
  func.func @transform_0(%arg0: i32) -> (i32, i32) {
    %c0_i32 = arith.constant 0 : i32
    %c0_i32_0 = arith.constant 0 : i32
    return %arg0, %c0_i32 : i32, i32
  }
  func.func @transform_1(%arg0: i32) -> (i32, i32, i32) {
    %c0_i32 = arith.constant 0 : i32
    %c0_i32_0 = arith.constant 0 : i32
    %c0_i32_1 = arith.constant 0 : i32
    return %c0_i32, %arg0, %c0_i32_0 : i32, i32, i32
  }
}

</mosaic_0001>

<bundles_post_ra>
// kernel: embed.1
= control target key start
LH: loop header
LB: loop body
LE: loop exit
PB: predicated region body
PF: predicated region fallthrough
CT: control target
= control target key end

     0   :  { %v572_v20 = vmov 683565275   ;;  %v573_v22 = vmov 2475754826   ;;  %v574_v24 = vmov 2131351028   ;;  %s675_s0 = inlined_call_operand.vmem [shape: f32[2,128], index: 0, kind: input, shape index: {}]   ;;  %s676_s1 = inlined_call_operand.vmem [shape: f32[8,2,128], index: 1, kind: output, shape index: {}]  }
   0x1   :  { %v591_v0 = vld [vmem:[%s675_s0] sm:$0xff]  ;;  %v575_v26 = vmov 2102212464   ;;  %v576_v28 = vmov 920167782  }
   0x2   :  { %v9_v1 = vand.u32 2147483647, %v591_v0  ;;  %v12_v2 = vand.u32 2139095040, %v591_v0  ;;  %v598_v5 = vmul.f32 2.3333333, %v591_v0  ;;  %vm11_vm14 = vcmp.lt.s32.totalorder %v591_v0, 0 }
   0x3   :  { %v577_v36 = vmov 1326507024  }
   0x4   :  { %v13_v3 = vshrl.u32 %v12_v2, 23  ;;  %v16_v4 = vand.u32 8388607, %v9_v1  ;;  %v220_v7 = vand.u32 2147483647, %v598_v5  ;;  %v223_v8 = vand.u32 2139095040, %v598_v5 }
   0x5   :  { %vm10_vm15 = vcmp.le.f32.partialorder %v9_v1, 0.7853982 }
   0x6   :  { %v534_v6 = vadd.s32 4294967169, %v13_v3  ;;  %v17_v10 = vor.u32 8388608, %v16_v4  ;;  %v224_v11 = vshrl.u32 %v223_v8, 23  ;;  %v227_v14 = vand.u32 8388607, %v220_v7 }
   0x8   :  { %v19_v9 = vadd.s32 1, %v534_v6  ;;  %v542_v13 = vadd.s32 4294967169, %v224_v11  ;;  %v604_v17 = vshll.u32 %v17_v10, 8  ;;  %v228_v30 = vor.u32 8388608, %v227_v14 }
   0xa   :  { %vm20_vm0 = vcmp.gt.s32.totalorder %v19_v9, 0  ;;  %v230_v18 = vadd.s32 1, %v542_v13  ;;  %v268_v58 = vshll.u32 %v228_v30, 8 }
   0xb   :  { %v21_v12 = vsel %vm20_vm0, %v19_v9, 0  ;;  %vm222_vm0 = vcmp.lt.s32.totalorder %v598_v5, 0 }
   0xc   :  { %v22_v15 = vshrl.u32 %v21_v12, 5  ;;  %v23_v16 = vand.u32 31, %v21_v12  ;;  %vm231_vm4 = vcmp.gt.s32.totalorder %v230_v18, 0 }
   0xd   :  { %v232_v43 = vsel %vm231_vm4, %v230_v18, 0 }
   0xe   :  { %v24_v19 = vsub.s32 32, %v23_v16  ;;  %v26_v21 = vshll.u32 %v572_v20, %v23_v16  ;;  %v29_v23 = vshll.u32 %v573_v22, %v23_v16  ;;  %v32_v25 = vshll.u32 %v574_v24, %v23_v16 }
   0xf   :  { %v35_v27 = vshll.u32 %v575_v26, %v23_v16  ;;  %v38_v29 = vshll.u32 %v576_v28, %v23_v16  ;;  %vm41_vm1 = vcmp.lt.s32.totalorder %v22_v15, 1  ;;  %vm42_vm2 = vcmp.lt.s32.totalorder %v22_v15, 2 }
  0x10   :  { %v25_v31 = vshrl.u32 %v572_v20, %v24_v19  ;;  %v27_v32 = vshrl.u32 %v573_v22, %v24_v19  ;;  %v30_v33 = vshrl.u32 %v574_v24, %v24_v19  ;;  %v33_v34 = vshrl.u32 %v575_v26, %v24_v19 }
  0x11   :  { %v36_v35 = vshrl.u32 %v576_v28, %v24_v19  ;;  %v39_v37 = vshrl.u32 %v577_v36, %v24_v19  ;;  %vm44_vm3 = vcmp.lt.s32.totalorder %v22_v15, 4  ;;  %vm43_vm5 = vcmp.lt.s32.totalorder %v22_v15, 3 }
  0x12   :  { %v28_v38 = vor.u32 %v27_v32, %v26_v21  ;;  %v31_v39 = vor.u32 %v30_v33, %v29_v23  ;;  %v34_v40 = vor.u32 %v33_v34, %v32_v25  ;;  %v233_v53 = vshrl.u32 %v232_v43, 5 }
  0x13   :  { %v37_v41 = vor.u32 %v36_v35, %v35_v27  ;;  %v40_v42 = vor.u32 %v39_v37, %v38_v29  ;;  %v234_v54 = vand.u32 31, %v232_v43 }
  0x14   :  { %v45_v44 = vsel %vm41_vm1, %v25_v31, %v28_v38  ;;  %v46_v45 = vsel %vm44_vm3, %v34_v40, 2102212464  ;;  %v49_v46 = vsel %vm41_vm1, %v28_v38, %v31_v39  ;;  %v53_v47 = vsel %vm41_vm1, %v31_v39, %v34_v40 }
  0x15   :  { %v47_v48 = vsel %vm43_vm5, %v31_v39, %v46_v45  ;;  %v50_v49 = vsel %vm44_vm3, %v37_v41, 920167782  ;;  %v54_v50 = vsel %vm44_vm3, %v40_v42, 1326507024  ;;  %v235_v63 = vsub.s32 32, %v234_v54 }
  0x16   :  { %v51_v51 = vsel %vm43_vm5, %v34_v40, %v50_v49  ;;  %v55_v52 = vsel %vm43_vm5, %v37_v41, %v54_v50  ;;  %v48_v55 = vsel %vm42_vm2, %v45_v44, %v47_v48  ;;  %v237_v2 = vshll.u32 %v572_v20, %v234_v54 }
  0x17   :  { %v52_v56 = vsel %vm42_vm2, %v49_v46, %v51_v51  ;;  %v56_v57 = vsel %vm42_vm2, %v53_v47, %v55_v52  ;;  %v240_v3 = vshll.u32 %v573_v22, %v234_v54  ;;  %v243_v4 = vshll.u32 %v574_v24, %v234_v54 }
  0x18   :  { %v613_v59 = vmul.u32.u64.low %v604_v17, %v56_v57  ;;  %v614_v60 = vmul.u32.u64.high %v604_v17, %v56_v57, %v613_v59  ;;  %v617_v61 = vmul.u32.u64.low %v604_v17, %v52_v56  ;;  %v618_v62 = vmul.u32.u64.high %v604_v17, %v52_v56, %v617_v61 }
  0x19   :  { %v64_v6 = vmul.u32 %v604_v17, %v48_v55  ;;  %v246_v8 = vshll.u32 %v575_v26, %v234_v54  ;;  %v249_v9 = vshll.u32 %v576_v28, %v234_v54  ;;  %vm252_vm6 = vcmp.lt.s32.totalorder %v233_v53, 1 }
  0x1a   :  { %v236_v10 = vshrl.u32 %v572_v20, %v235_v63  ;;  %v238_v11 = vshrl.u32 %v573_v22, %v235_v63  ;;  %v241_v12 = vshrl.u32 %v574_v24, %v235_v63  ;;  %v244_v13 = vshrl.u32 %v575_v26, %v235_v63 }
  0x1b   :  { %vm66_vm7 = vc.u32 %v614_v60, %v617_v61  ;;  %v67_v14 = vadd.s32 1, %v618_v62  ;;  %v247_v15 = vshrl.u32 %v576_v28, %v235_v63  ;;  %vm253_vm8 = vcmp.lt.s32.totalorder %v233_v53, 2 }
  0x1c   :  { %v239_v16 = vor.u32 %v238_v11, %v237_v2  ;;  %v242_v18 = vor.u32 %v241_v12, %v240_v3  ;;  %v245_v19 = vor.u32 %v244_v13, %v243_v4  ;;  %v250_v21 = vshrl.u32 %v577_v36, %v235_v63 }
  0x1d   :  { %v68_v23 = vsel %vm66_vm7, %v67_v14, %v618_v62  ;;  %v248_v17 = vor.u32 %v247_v15, %v246_v8  ;;  %vm254_vm9 = vcmp.lt.s32.totalorder %v233_v53, 3  ;;  %vm255_vm10 = vcmp.lt.s32.totalorder %v233_v53, 4 }
  0x1e   :  { %v69_v25 = vadd.s32 %v68_v23, %v64_v6  ;;  %v251_v20 = vor.u32 %v250_v21, %v249_v9  ;;  %v256_v22 = vsel %vm252_vm6, %v236_v10, %v239_v16  ;;  %v257_v24 = vsel %vm255_vm10, %v245_v19, 2102212464 }
  0x1f   :  { %v258_v26 = vsel %vm254_vm9, %v242_v18, %v257_v24  ;;  %v260_v27 = vsel %vm252_vm6, %v239_v16, %v242_v18  ;;  %v261_v29 = vsel %vm255_vm10, %v248_v17, 920167782  ;;  %v264_v28 = vsel %vm252_vm6, %v242_v18, %v245_v19 }
  0x20   :  { %v70_v30 = vadd.s32 536870912, %v69_v25  ;;  %v262_v31 = vsel %vm254_vm9, %v245_v19, %v261_v29  ;;  %v265_v32 = vsel %vm255_vm10, %v251_v20, 1326507024  ;;  %v259_v33 = vsel %vm253_vm8, %v256_v22, %v258_v26 }
  0x21   :  { %v263_v34 = vsel %vm253_vm8, %v260_v27, %v262_v31  ;;  %v266_v35 = vsel %vm254_vm9, %v248_v17, %v265_v32  ;;  %v275_v43 = vmul.u32 %v268_v58, %v259_v33  ;;  %v65_v55 = vadd.s32 %v617_v61, %v614_v60 }
  0x22   :  { %v71_v36 = vshrl.u32 %v70_v30, 30  ;;  %v267_v37 = vsel %vm253_vm8, %v264_v28, %v266_v35  ;;  %v630_v38 = vmul.u32.u64.low %v268_v58, %v263_v34  ;;  %v631_v39 = vmul.u32.u64.high %v268_v58, %v263_v34, %v630_v38 }
  0x23   :  { %v633_v40 = vmul.u32.u64.low %v268_v58, %v267_v37  ;;  %v634_v41 = vmul.u32.u64.high %v268_v58, %v267_v37, %v633_v40  ;;  %vm221_vm1 = vcmp.le.f32.partialorder %v220_v7, 0.7853982  ;;  %vm101_vm8 = vweird.f32 %v591_v0 }
  0x24   :  { %v72_v42 = vshll.u32 %v71_v36, 30  ;;  %v278_v45 = vadd.s32 1, %v631_v39  ;;  %v95_v15 = vsub.s32 4, %v71_v36 }
  0x25   :  { %vm277_vm11 = vc.u32 %v634_v41, %v630_v38  ;;  %v276_v14 = vadd.s32 %v630_v38, %v634_v41 }
  0x26   :  { %v73_v44 = vsub.s32 %v69_v25, %v72_v42  ;;  %v279_v47 = vsel %vm277_vm11, %v278_v45, %v631_v39  ;;  %v96_v20 = vsel %vm11_vm14, %v95_v15, %v71_v36 }
  0x27   :  { %v280_v48 = vadd.s32 %v279_v47, %v275_v43  ;;  %v98_v28 = vsel %vm10_vm15, 0, %v96_v20 }
  0x28   :  { %v75_v46 = vsub.s32 0, %v73_v44  ;;  %v102_v31 = vadd.s32 3, %v98_v28  ;;  %v206_v36 = vand.u32 3, %v98_v28 }
  0x29   :  { %v281_v50 = vadd.s32 536870912, %v280_v48 }
  0x2a   :  { %v535_v49 = vmin.u32 %v75_v46, %v73_v44  ;;  %v103_v34 = vand.u32 3, %v102_v31  ;;  %vm211_vm3 = vcmp.eq.s32.totalorder %v206_v36, 2  ;;  %vm208_vm5 = vcmp.eq.s32.totalorder %v206_v36, 0 }
  0x2b   :  { %v282_v52 = vshrl.u32 %v281_v50, 30  ;;  %vm207_vm7 = vcmp.lt.s32.totalorder %v206_v36, 2 }
  0x2c   :  { %v77_v51 = vclz %v535_v49  ;;  %vm108_vm2 = vcmp.eq.s32.totalorder %v103_v34, 2  ;;  %vm105_vm4 = vcmp.eq.s32.totalorder %v103_v34, 0  ;;  %vm104_vm6 = vcmp.lt.s32.totalorder %v103_v34, 2 }
  0x2d   :  { %v283_v54 = vshll.u32 %v282_v52, 30  ;;  %v306_v1 = vsub.s32 4, %v282_v52 }
  0x2e   :  { %v536_v53 = vadd.s32 4294967294, %v77_v51 }
  0x2f   :  { %v284_v57 = vsub.s32 %v280_v48, %v283_v54  ;;  %v307_v37 = vsel %vm222_vm0, %v306_v1, %v282_v52 }
  0x30   :  { %vm537_vm12 = vcmp.lt.s32.totalorder %v536_v53, 0  ;;  %v309_v40 = vsel %vm221_vm1, 0, %v307_v37 }
  0x31   :  { %v80_v56 = vsel %vm537_vm12, 0, %v536_v53  ;;  %v286_v63 = vsub.s32 0, %v284_v57  ;;  %v417_v53 = vand.u32 3, %v309_v40 }
  0x32   :  { %v81_v58 = vsub.s32 32, %v80_v56  ;;  %v82_v59 = vshll.u32 %v73_v44, %v80_v56  ;;  %v85_v62 = vsub.s32 4294967266, %v80_v56  ;;  %v313_v44 = vadd.s32 3, %v309_v40 }
  0x33   :  { %v543_v4 = vmin.u32 %v286_v63, %v284_v57  ;;  %vm422_vm10 = vcmp.eq.s32.totalorder %v417_v53, 2  ;;  %vm419_vm12 = vcmp.eq.s32.totalorder %v417_v53, 0 }
  0x34   :  { %v83_v2 = vshrl.u32 %v65_v55, %v81_v58  ;;  %v86_v3 = vadd.s32 127, %v85_v62  ;;  %v314_v52 = vand.u32 3, %v313_v44 }
  0x35   :  { %v288_v9 = vclz %v543_v4 }
  0x36   :  { %v84_v6 = vor.u32 %v83_v2, %v82_v59  ;;  %v87_v8 = vshll.u32 %v86_v3, 23  ;;  %vm319_vm9 = vcmp.eq.s32.totalorder %v314_v52, 2  ;;  %vm316_vm11 = vcmp.eq.s32.totalorder %v314_v52, 0 }
  0x37   :  { %v544_v12 = vadd.s32 4294967294, %v288_v9 }
  0x38   :  { %v88_v10 = vor.u32 4788187, %v87_v8  ;;  %v91_v11 = vcvt.s32.f32 %v84_v6 }
  0x39   :  { %vm545_vm13 = vcmp.lt.s32.totalorder %v544_v12, 0 }
  0x3a   :  { %v89_v13 = vand.u32 2147483647, %v88_v10  ;;  %v291_v61 = vsel %vm545_vm13, 0, %v544_v12  ;;  %vm315_vm13 = vcmp.lt.s32.totalorder %v314_v52, 2 }
  0x3b   :  { %v292_v16 = vsub.s32 32, %v291_v61  ;;  %v293_v18 = vshll.u32 %v284_v57, %v291_v61  ;;  %v296_v19 = vsub.s32 4294967266, %v291_v61 }
  0x3c   :  { %v92_v60 = vmul.f32 %v91_v11, %v89_v13 }
  0x3d   :  { %v294_v23 = vshrl.u32 %v276_v14, %v292_v16  ;;  %v297_v17 = vadd.s32 127, %v296_v19 }
  0x3e   :  { %v93_v21 = vxor.u32 2147483648, %v92_v60 }
  0x3f   :  { %v295_v24 = vor.u32 %v294_v23, %v293_v18  ;;  %v298_v26 = vshll.u32 %v297_v17, 23 }
  0x40   :  { %v94_v25 = vsel %vm11_vm14, %v93_v21, %v92_v60  ;;  %vm418_vm14 = vcmp.lt.s32.totalorder %v417_v53, 2 }
  0x41   :  { %v97_v22 = vsel %vm10_vm15, %v591_v0, %v94_v25  ;;  %v299_v27 = vor.u32 4788187, %v298_v26  ;;  %v302_v29 = vcvt.s32.f32 %v295_v24  ;;  %vm312_vm15 = vweird.f32 %v598_v5 }
  0x42   :  { %564 = vcosq.f32 %v97_v22 }
  0x43   :  { %566 = vsinq.f32 %v97_v22  ;;  %v300_v30 = vand.u32 2147483647, %v299_v27 }
  0x45   :  { %v303_v32 = vmul.f32 %v302_v29, %v300_v30 }
  0x47   :  { %v304_v33 = vxor.u32 2147483648, %v303_v32 }
  0x49   :  { %v305_v35 = vsel %vm222_vm0, %v304_v33, %v303_v32 }
  0x4a   :  { %v308_v38 = vsel %vm221_vm1, %v598_v5, %v305_v35 }
  0x4b   :  { %568 = vcosq.f32 %v308_v38 }
  0x4c   :  { %570 = vsinq.f32 %v308_v38 }
  0x4f   :  { %v565_v39 = vpop.eup %564 }
  0x50   :  { %v567_v41 = vpop.eup %566  ;;  %v109_v42 = vxor.u32 2147483648, %v565_v39 }
  0x51   :  { %v106_v43 = vxor.u32 2147483648, %v567_v41 }
  0x52   :  { %v110_v7 = vsel %vm108_vm2, %v109_v42, %v567_v41  ;;  %v213_v45 = vsel %vm211_vm3, %v109_v42, %v567_v41 }
  0x53   :  { %v107_v46 = vsel %vm105_vm4, %v565_v39, %v106_v43  ;;  %v210_v47 = vsel %vm208_vm5, %v565_v39, %v106_v43 }
  0x54   :  { %v111_v48 = vsel %vm104_vm6, %v107_v46, %v110_v7  ;;  %v214_v49 = vsel %vm207_vm7, %v210_v47, %v213_v45 }
  0x55   :  { %v112_v50 = vsel %vm101_vm8, nan, %v111_v48  ;;  %v215_v51 = vsel %vm101_vm8, nan, %v214_v49 }
  0x56   :  { %216 = vst [vmem:[#allocation2 + $0x30] sm:$0xff] %v112_v50  ;;  %218 = vst [vmem:[#allocation2] sm:$0xff] %v215_v51 }
  0x58   :  { %v569_v54 = vpop.eup %568 }
  0x59   :  { %v571_v55 = vpop.eup %570  ;;  %v320_v56 = vxor.u32 2147483648, %v569_v54 }
  0x5a   :  { %v317_v0 = vxor.u32 2147483648, %v571_v55 }
  0x5b   :  { %v321_v57 = vsel %vm319_vm9, %v320_v56, %v571_v55  ;;  %v424_v58 = vsel %vm422_vm10, %v320_v56, %v571_v55 }
  0x5c   :  { %v318_v63 = vsel %vm316_vm11, %v569_v54, %v317_v0  ;;  %v421_v2 = vsel %vm419_vm12, %v569_v54, %v317_v0 }
  0x5d   :  { %v475_v59 = vld [vmem:[#allocation2 + $0x30] sm:$0x3]  ;;  %v477_v62 = vld [vmem:[#allocation2] sm:$0x3]  ;;  %v322_v3 = vsel %vm315_vm13, %v318_v63, %v321_v57  ;;  %v425_v4 = vsel %vm418_vm14, %v421_v2, %v424_v58 }
  0x5e   :  { %476 = vst [vmem:[%s676_s1] sm:$0x3] %v475_v59  ;;  %478 = vst [vmem:[%s676_s1 + $0x2] sm:$0x3] %v477_v62  ;;  %v323_v6 = vsel %vm312_vm15, nan, %v322_v3  ;;  %v426_v8 = vsel %vm312_vm15, nan, %v425_v4 }
  0x5f   :  { %v427_v9 = vmul.f32 %v426_v8, %v112_v50  ;;  %v431_v5 = vmul.f32 %v323_v6, %v112_v50  ;;  %v428_v10 = vmul.f32 %v323_v6, %v215_v51  ;;  %v430_v11 = vmul.f32 %v426_v8, %v215_v51 }
  0x61   :  { %v429_v12 = vadd.f32 %v428_v10, %v427_v9  ;;  %v432_v13 = vsub.f32 %v430_v11, %v431_v5 }
  0x63   :  { %434 = vst [vmem:[#allocation2 + $0x18] sm:$0xff] %v429_v12  ;;  %436 = vst [vmem:[#allocation2 + $0x10] sm:$0xff] %v432_v13  ;;  %v437_v14 = vmul.f32 %v429_v12, %v426_v8  ;;  %v438_v60 = vmul.f32 %v432_v13, %v323_v6  ;;  %v440_v61 = vmul.f32 %v432_v13, %v426_v8 }
  0x64   :  { %v441_v15 = vmul.f32 %v429_v12, %v323_v6 }
  0x65   :  { %v439_v16 = vadd.f32 %v438_v60, %v437_v14 }
  0x66   :  { %v442_v18 = vsub.f32 %v440_v61, %v441_v15 }
  0x67   :  { %444 = vst [vmem:[#allocation2 + $0x8] sm:$0xff] %v439_v16  ;;  %v447_v19 = vmul.f32 %v439_v16, %v426_v8  ;;  %v451_v17 = vmul.f32 %v439_v16, %v323_v6 }
  0x68   :  { %446 = vst [vmem:[#allocation2 + $0x20] sm:$0xff] %v442_v18  ;;  %v448_v21 = vmul.f32 %v442_v18, %v323_v6  ;;  %v450_v23 = vmul.f32 %v442_v18, %v426_v8 }
  0x6a   :  { %v449_v25 = vadd.f32 %v448_v21, %v447_v19  ;;  %v452_v20 = vsub.f32 %v450_v23, %v451_v17  ;;  %v479_v22 = vld [vmem:[#allocation2 + $0x18] sm:$0x3]  ;;  %v481_v24 = vld [vmem:[#allocation2 + $0x10] sm:$0x3] }
  0x6b   :  { %480 = vst [vmem:[%s676_s1 + $0x4] sm:$0x3] %v479_v22  ;;  %482 = vst [vmem:[%s676_s1 + $0x6] sm:$0x3] %v481_v24 }
  0x6c   :  { %454 = vst [vmem:[#allocation2 + $0x28] sm:$0xff] %v449_v25  ;;  %456 = vst [vmem:[#allocation2 + $0x38] sm:$0xff] %v452_v20 }
  0x6e   :  { %v483_v26 = vld [vmem:[#allocation2 + $0x8] sm:$0x3] }
  0x6f   :  { %v485_v27 = vld [vmem:[#allocation2 + $0x20] sm:$0x3]  ;;  %484 = vst [vmem:[%s676_s1 + $0x8] sm:$0x3] %v483_v26 }
  0x70   :  { %486 = vst [vmem:[%s676_s1 + $0xa] sm:$0x3] %v485_v27 }
  0x73   :  { %v487_v29 = vld [vmem:[#allocation2 + $0x28] sm:$0x3]  ;;  %v489_v28 = vld [vmem:[#allocation2 + $0x38] sm:$0x3] }
  0x74   :  { %488 = vst [vmem:[%s676_s1 + $0xc] sm:$0x3] %v487_v29  ;;  %490 = vst [vmem:[%s676_s1 + $0xe] sm:$0x3] %v489_v28 }

</bundles_post_ra>
